<compile_context>
chip_gen: v7x
topology: tpu7x:2x2x1
jax: 0.10.0
libtpu: 0.0.40
codegen_flags: <defaults>
</compile_context>

<pallas_src>
import functools
import math

import jax
import jax.numpy as jnp
from jax.experimental import pallas as pl
from jax.experimental.pallas import tpu as pltpu


# ----------------------------------------------------------------------------- kernels
def _affine_store(o_ref, y, w_ref, b_ref):
    # Final scale/shift.  For bf16 outputs do it on the packed bf16 VALU (v6e/v7x);
    # otherwise stay in f32 and cast once at the store.
    if o_ref.dtype == jnp.bfloat16:
        o_ref[...] = (y.astype(jnp.bfloat16) * w_ref[...].astype(jnp.bfloat16)
                      + b_ref[...].astype(jnp.bfloat16))
    else:
        w = w_ref[...].astype(jnp.float32)
        b = b_ref[...].astype(jnp.float32)
        o_ref[...] = (y * w + b).astype(o_ref.dtype)


def _layernorm_kernel(x_ref, w_ref, b_ref, o_ref, *, eps):
    # Unpacked path (hidden >= 128 or fallback): one row per vreg row, reduce over lanes.
    x = x_ref[...].astype(jnp.float32)
    u = jnp.mean(x, axis=-1, keepdims=True)
    xc = x - u
    s = jnp.mean(xc * xc, axis=-1, keepdims=True)
    inv = jax.lax.rsqrt(s + eps)                 # eps inside the sqrt (TF style), EUP op
    _affine_store(o_ref, xc * inv, w_ref, b_ref)


def _layernorm_packed_kernel(x_ref, w_ref, b_ref, s_ref, st_ref, o_ref, *, eps, inv_hidden):
    # Packed path: each 128-lane row of x_ref holds `pack` original rows back to back.
    # s_ref: (L, pack) 0/1 segment matrix (bf16); st_ref: (pack, L) = S^T.
    # Segmented sums / broadcast-backs use the idle MXU.  Operands are split into
    # bf16 hi + bf16 lo so the result is exact to ~2^-18 even with bf16 multipliers.
    f32 = jnp.float32
    S = s_ref[...]
    St = st_ref[...]

    def seg_op(v, m):                      # accurate (v @ m), v f32, m is 0/1-valued bf16
        hi = v.astype(jnp.bfloat16)
        lo = (v - hi.astype(f32)).astype(jnp.bfloat16)
        return (jnp.dot(hi, m, preferred_element_type=f32)
                + jnp.dot(lo, m, preferred_element_type=f32))

    x = x_ref[...].astype(f32)                       # (tr, L) lane-dense
    mean = seg_op(x, S) * inv_hidden                 # (tr, pack)
    xc = x - seg_op(mean, St)                        # broadcast mean back per segment
    var = seg_op(xc * xc, S) * inv_hidden            # (tr, pack)
    inv = jax.lax.rsqrt(var + eps)                   # eps inside the sqrt (TF style)
    y = xc * seg_op(inv, St)                         # (tr, L)
    _affine_store(o_ref, y, w_ref, b_ref)


# ----------------------------------------------------------------------------- sizing helpers
def _round_up(x, m):
    return ((x + m - 1) // m) * m


def _device_tensorcores():
    # Heuristic only affects tiling choices, never correctness.
    try:
        kind = jax.devices()[0].device_kind.lower()
    except Exception:
        return 1
    return 2 if any(t in kind for t in ("v7", "7x", "v5p", "v4")) else 1


def _vmem_capacity_bytes():
    try:
        return int(pltpu.get_tpu_info().vmem_capacity_bytes)
    except Exception:
        return 64 << 20           # v7x per-TC physical VMEM; conservative for v5e/v6e


def _pick_tile_rows(rows, lanes, in_bytes, row_align, min_grid_steps):
    """Largest row block with an ~2 MiB input block, keeping >= min_grid_steps steps."""
    block_budget = 2 << 20
    per_row = lanes * in_bytes
    tile_rows = max(row_align, block_budget // per_row)
    cap = max(row_align, rows // max(1, min_grid_steps))
    tile_rows = min(tile_rows, cap)
    if tile_rows >= rows:
        return int(rows)                               # single full-extent block (always legal)
    return int(max(row_align, (tile_rows // row_align) * row_align))


# ----------------------------------------------------------------------------- wrapper
def layer_norm(x, weight, bias, eps=1e-12, tile_rows=None):
    """x: (..., hidden); weight, bias: (hidden,). Returns same shape/dtype as x."""
    orig_shape = x.shape
    hidden = orig_shape[-1]
    rows = math.prod(orig_shape[:-1]) if len(orig_shape) > 1 else 1

    in_bytes = x.dtype.itemsize
    row_align = {4: 8, 2: 16, 1: 32}.get(in_bytes, 8)      # native sublane packing

    num_tc = _device_tensorcores()
    min_grid_steps = 8 if num_tc > 1 else 2
    explicit_tile = tile_rows is not None

    # Lane-dense packing for small hidden sizes.
    pack = 1
    if 0 < hidden < 128 and 128 % hidden == 0 and rows % (128 // hidden) == 0:
        pack = 128 // hidden
    # TODO(synk): hidden < 128 with 128 % hidden != 0 (or a ragged row count) still
    # uses the lane-sparse fallback below; a remainder-row tail kernel would cover it.

    width = pack * hidden                       # last dim of the 2-D view fed to the kernel
    lanes = width if pack > 1 else _round_up(hidden, 128)   # VMEM lane footprint per row
    grid_rows = rows // pack

    if tile_rows is None:
        tile_rows = _pick_tile_rows(grid_rows, lanes, in_bytes, row_align, min_grid_steps)
        # Balance steps across both TensorCores on 2-TC chips (v7x): avoid odd grids.
        if num_tc > 1 and tile_rows < grid_rows:
            steps = pl.cdiv(grid_rows, tile_rows)
            if steps > 1 and steps % num_tc:
                cand = _round_up(pl.cdiv(grid_rows, steps + (num_tc - steps % num_tc)),
                                 row_align)
                if 0 < cand < grid_rows:
                    tile_rows = cand
    tile_rows = int(tile_rows)

    x2 = x.reshape(grid_rows, width)            # row-major, free
    if pack > 1:
        w2 = jnp.tile(weight, pack).reshape(1, width)
        b2 = jnp.tile(bias, pack).reshape(1, width)
        seg_ids = jnp.arange(width, dtype=jnp.int32) // hidden
        S = (seg_ids[:, None] == jnp.arange(pack, dtype=jnp.int32)[None, :]).astype(jnp.bfloat16)
        St = S.T
    else:
        w2 = weight.reshape(1, width)
        b2 = bias.reshape(1, width)

    grid = (pl.cdiv(grid_rows, tile_rows),)     # ragged tail handled by Pallas masking

    # VMEM: double-buffered in/out blocks (lane padded) + f32 working set + headroom.
    in_block = tile_rows * lanes * in_bytes
    out_block = tile_rows * lanes * in_bytes
    f32_ws = 4 * tile_rows * lanes * 4
    need = 2 * in_block + 2 * out_block + f32_ws + (2 << 20)
    vmem_cap = _vmem_capacity_bytes()
    ceiling = (vmem_cap - (4 << 20)) if explicit_tile else (vmem_cap * 3) // 4
    vmem_limit = int(min(max(16 << 20, need), ceiling))

    cost = pl.CostEstimate(
        flops=int(10 * rows * hidden),
        transcendentals=int(rows),
        bytes_accessed=int(2 * rows * hidden * in_bytes + 2 * hidden * weight.dtype.itemsize),
    )

    common = dict(
        out_shape=jax.ShapeDtypeStruct((grid_rows, width), x.dtype),
        compiler_params=pltpu.CompilerParams(
            dimension_semantics=("parallel",),
            vmem_limit_bytes=vmem_limit,
        ),
        cost_estimate=cost,
    )

    if pack > 1:
        out = pl.pallas_call(
            functools.partial(_layernorm_packed_kernel, eps=eps, inv_hidden=1.0 / hidden),
            grid_spec=pltpu.PrefetchScalarGridSpec(
                num_scalar_prefetch=0,
                grid=grid,
                in_specs=[
                    pl.BlockSpec((tile_rows, width), lambda i: (i, 0)),
                    pl.BlockSpec((1, width), lambda i: (0, 0)),
                    pl.BlockSpec((1, width), lambda i: (0, 0)),
                    pl.BlockSpec((width, pack), lambda i: (0, 0)),
                    pl.BlockSpec((pack, width), lambda i: (0, 0)),
                ],
                out_specs=pl.BlockSpec((tile_rows, width), lambda i: (i, 0)),
            ),
            **common,
        )(x2, w2, b2, S, St)
    else:
        out = pl.pallas_call(
            functools.partial(_layernorm_kernel, eps=eps),
            grid_spec=pltpu.PrefetchScalarGridSpec(
                num_scalar_prefetch=0,
                grid=grid,
                in_specs=[
                    pl.BlockSpec((tile_rows, width), lambda i: (i, 0)),
                    pl.BlockSpec((1, width), lambda i: (0, 0)),
                    pl.BlockSpec((1, width), lambda i: (0, 0)),
                ],
                out_specs=pl.BlockSpec((tile_rows, width), lambda i: (i, 0)),
            ),
            **common,
        )(x2, w2, b2)

    return out.reshape(orig_shape)


# ----------------------------------------------------------------------------- demo / check
def _ref_layernorm(x, w, b, eps):
    u = x.mean(-1, keepdims=True)
    s = ((x - u) ** 2).mean(-1, keepdims=True)
    return w * ((x - u) / jnp.sqrt(s + eps)) + b


if __name__ == "__main__":
    key = jax.random.PRNGKey(0)

    # 1) Module-like shapes: hidden=32 -> packed lane-dense path (pack=4).
    batch, seq, hidden = 2, 8, 32
    x = jax.random.normal(key, (batch, seq, hidden), dtype=jnp.float32)
    weight = jnp.ones((hidden,), dtype=jnp.float32)     # nn.Parameter(torch.ones(hidden))
    bias = jnp.zeros((hidden,), dtype=jnp.float32)      # nn.Parameter(torch.zeros(hidden))
    y = jax.block_until_ready(layer_norm(x, weight, bias, eps=1e-12))
    assert jnp.allclose(y, _ref_layernorm(x, weight, bias, 1e-12), atol=1e-5, rtol=1e-5), \
        "mismatch (packed path)"

    # 2) hidden >= 128 -> unpacked path, non-trivial affine params.
    k1, k2, k3 = jax.random.split(key, 3)
    h2 = 256
    x2 = jax.random.normal(k1, (4, 8, h2), dtype=jnp.float32)
    w2 = jax.random.normal(k2, (h2,), dtype=jnp.float32)
    b2 = jax.random.normal(k3, (h2,), dtype=jnp.float32)
    y2 = jax.block_until_ready(layer_norm(x2, w2, b2, eps=1e-12))
    assert jnp.allclose(y2, _ref_layernorm(x2, w2, b2, 1e-12), atol=1e-5, rtol=1e-5), \
        "mismatch (unpacked path)"

    # 3) Ragged grid (explicit small tile) on the packed path (hidden=64 -> pack=2).
    k4, k5, k6 = jax.random.split(k1, 3)
    h3 = 64
    x3 = jax.random.normal(k4, (5, 8, h3), dtype=jnp.float32)
    w3 = jax.random.normal(k5, (h3,), dtype=jnp.float32)
    b3 = jax.random.normal(k6, (h3,), dtype=jnp.float32)
    y3 = jax.block_until_ready(layer_norm(x3, w3, b3, eps=1e-12, tile_rows=8))
    assert jnp.allclose(y3, _ref_layernorm(x3, w3, b3, 1e-12), atol=1e-5, rtol=1e-5), \
        "mismatch (ragged packed path)"

    print("KERNEL_OK")
</pallas_src>

<mosaic_0001>
module attributes {stable_mosaic.version = 11 : i64} {
  func.func @_layernorm_packed_kernel(%arg0: i32, %arg1: memref<4x128xf32, #tpu.memory_space<vmem>>, %arg2: memref<1x128xf32, #tpu.memory_space<vmem>>, %arg3: memref<1x128xf32, #tpu.memory_space<vmem>>, %arg4: memref<128x4xbf16, #tpu.memory_space<vmem>>, %arg5: memref<4x128xbf16, #tpu.memory_space<vmem>>, %arg6: memref<4x128xf32, #tpu.memory_space<vmem>>) attributes {dimension_semantics = [#tpu.dimension_semantics<parallel>], iteration_bounds = array<i64: 1>, scalar_prefetch = 0 : i64, scratch_operands = 0 : i64, tpu.core_type = #tpu.core_type<tc>, window_params = [{transform_indices = @transform_0, window_bounds = array<i64: 4, 128>}, {pipeline_mode = #tpu.pipeline_mode<synchronous>, transform_indices = @transform_1, window_bounds = array<i64: 1, 128>}, {pipeline_mode = #tpu.pipeline_mode<synchronous>, transform_indices = @transform_2, window_bounds = array<i64: 1, 128>}, {pipeline_mode = #tpu.pipeline_mode<synchronous>, transform_indices = @transform_3, window_bounds = array<i64: 128, 4>}, {pipeline_mode = #tpu.pipeline_mode<synchronous>, transform_indices = @transform_4, window_bounds = array<i64: 4, 128>}, {transform_indices = @transform_5, window_bounds = array<i64: 4, 128>}]} {
    %c0 = arith.constant 0 : index
    %c0_0 = arith.constant 0 : index
    %0 = vector.load %arg4[%c0, %c0_0] : memref<128x4xbf16, #tpu.memory_space<vmem>>, vector<128x4xbf16>
    %c0_1 = arith.constant 0 : index
    %c0_2 = arith.constant 0 : index
    %1 = vector.load %arg5[%c0_1, %c0_2] : memref<4x128xbf16, #tpu.memory_space<vmem>>, vector<4x128xbf16>
    %c0_3 = arith.constant 0 : index
    %c0_4 = arith.constant 0 : index
    %2 = vector.load %arg1[%c0_3, %c0_4] : memref<4x128xf32, #tpu.memory_space<vmem>>, vector<4x128xf32>
    %3 = arith.truncf %2 : vector<4x128xf32> to vector<4x128xbf16>
    %4 = arith.extf %3 : vector<4x128xbf16> to vector<4x128xf32>
    %5 = arith.subf %2, %4 : vector<4x128xf32>
    %6 = arith.truncf %5 : vector<4x128xf32> to vector<4x128xbf16>
    %cst = arith.constant dense<0.000000e+00> : vector<4x4xf32>
    %7 = tpu.matmul %3, %0, %cst {dimension_numbers = #tpu.dot_dimension_numbers<[1], [0], [0], [1], [0, 0, 1, 1], [], []>} : vector<4x128xbf16>, vector<128x4xbf16>, vector<4x4xf32> -> vector<4x4xf32>
    %cst_5 = arith.constant dense<0.000000e+00> : vector<4x4xf32>
    %8 = tpu.matmul %6, %0, %cst_5 {dimension_numbers = #tpu.dot_dimension_numbers<[1], [0], [0], [1], [0, 0, 1, 1], [], []>} : vector<4x128xbf16>, vector<128x4xbf16>, vector<4x4xf32> -> vector<4x4xf32>
    %9 = arith.addf %7, %8 : vector<4x4xf32>
    %cst_6 = arith.constant 3.125000e-02 : f32
    %10 = vector.broadcast %cst_6 : f32 to vector<4x4xf32>
    %11 = arith.mulf %9, %10 : vector<4x4xf32>
    %12 = arith.truncf %11 : vector<4x4xf32> to vector<4x4xbf16>
    %13 = arith.extf %12 : vector<4x4xbf16> to vector<4x4xf32>
    %14 = arith.subf %11, %13 : vector<4x4xf32>
    %15 = arith.truncf %14 : vector<4x4xf32> to vector<4x4xbf16>
    %cst_7 = arith.constant dense<0.000000e+00> : vector<4x128xf32>
    %16 = tpu.matmul %12, %1, %cst_7 {dimension_numbers = #tpu.dot_dimension_numbers<[1], [0], [0], [1], [0, 0, 1, 1], [], []>} : vector<4x4xbf16>, vector<4x128xbf16>, vector<4x128xf32> -> vector<4x128xf32>
    %cst_8 = arith.constant dense<0.000000e+00> : vector<4x128xf32>
    %17 = tpu.matmul %15, %1, %cst_8 {dimension_numbers = #tpu.dot_dimension_numbers<[1], [0], [0], [1], [0, 0, 1, 1], [], []>} : vector<4x4xbf16>, vector<4x128xbf16>, vector<4x128xf32> -> vector<4x128xf32>
    %18 = arith.addf %16, %17 : vector<4x128xf32>
    %19 = arith.subf %2, %18 : vector<4x128xf32>
    %20 = arith.mulf %19, %19 : vector<4x128xf32>
    %21 = arith.truncf %20 : vector<4x128xf32> to vector<4x128xbf16>
    %22 = arith.extf %21 : vector<4x128xbf16> to vector<4x128xf32>
    %23 = arith.subf %20, %22 : vector<4x128xf32>
    %24 = arith.truncf %23 : vector<4x128xf32> to vector<4x128xbf16>
    %cst_9 = arith.constant dense<0.000000e+00> : vector<4x4xf32>
    %25 = tpu.matmul %21, %0, %cst_9 {dimension_numbers = #tpu.dot_dimension_numbers<[1], [0], [0], [1], [0, 0, 1, 1], [], []>} : vector<4x128xbf16>, vector<128x4xbf16>, vector<4x4xf32> -> vector<4x4xf32>
    %cst_10 = arith.constant dense<0.000000e+00> : vector<4x4xf32>
    %26 = tpu.matmul %24, %0, %cst_10 {dimension_numbers = #tpu.dot_dimension_numbers<[1], [0], [0], [1], [0, 0, 1, 1], [], []>} : vector<4x128xbf16>, vector<128x4xbf16>, vector<4x4xf32> -> vector<4x4xf32>
    %27 = arith.addf %25, %26 : vector<4x4xf32>
    %cst_11 = arith.constant 3.125000e-02 : f32
    %28 = vector.broadcast %cst_11 : f32 to vector<4x4xf32>
    %29 = arith.mulf %27, %28 : vector<4x4xf32>
    %cst_12 = arith.constant 9.99999996E-13 : f32
    %30 = vector.broadcast %cst_12 : f32 to vector<4x4xf32>
    %31 = arith.addf %29, %30 : vector<4x4xf32>
    %32 = math.rsqrt %31 : vector<4x4xf32>
    %33 = arith.truncf %32 : vector<4x4xf32> to vector<4x4xbf16>
    %34 = arith.extf %33 : vector<4x4xbf16> to vector<4x4xf32>
    %35 = arith.subf %32, %34 : vector<4x4xf32>
    %36 = arith.truncf %35 : vector<4x4xf32> to vector<4x4xbf16>
    %cst_13 = arith.constant dense<0.000000e+00> : vector<4x128xf32>
    %37 = tpu.matmul %33, %1, %cst_13 {dimension_numbers = #tpu.dot_dimension_numbers<[1], [0], [0], [1], [0, 0, 1, 1], [], []>} : vector<4x4xbf16>, vector<4x128xbf16>, vector<4x128xf32> -> vector<4x128xf32>
    %cst_14 = arith.constant dense<0.000000e+00> : vector<4x128xf32>
    %38 = tpu.matmul %36, %1, %cst_14 {dimension_numbers = #tpu.dot_dimension_numbers<[1], [0], [0], [1], [0, 0, 1, 1], [], []>} : vector<4x4xbf16>, vector<4x128xbf16>, vector<4x128xf32> -> vector<4x128xf32>
    %39 = arith.addf %37, %38 : vector<4x128xf32>
    %40 = arith.mulf %19, %39 : vector<4x128xf32>
    %c0_15 = arith.constant 0 : index
    %c0_16 = arith.constant 0 : index
    %41 = vector.load %arg2[%c0_15, %c0_16] : memref<1x128xf32, #tpu.memory_space<vmem>>, vector<1x128xf32>
    %c0_17 = arith.constant 0 : index
    %c0_18 = arith.constant 0 : index
    %42 = vector.load %arg3[%c0_17, %c0_18] : memref<1x128xf32, #tpu.memory_space<vmem>>, vector<1x128xf32>
    %43 = vector.broadcast %41 : vector<1x128xf32> to vector<4x128xf32>
    %44 = arith.mulf %40, %43 : vector<4x128xf32>
    %45 = vector.broadcast %42 : vector<1x128xf32> to vector<4x128xf32>
    %46 = arith.addf %44, %45 : vector<4x128xf32>
    %c0_19 = arith.constant 0 : index
    %c0_20 = arith.constant 0 : index
    %47 = vector.load %arg6[%c0_19, %c0_20] : memref<4x128xf32, #tpu.memory_space<vmem>>, vector<4x128xf32>
    tpu.vector_store %arg6[%c0_19, %c0_20], %46 {strides = array<i32>} : memref<4x128xf32, #tpu.memory_space<vmem>>, vector<4x128xf32>,
    return
  }
  func.func @transform_0(%arg0: i32) -> (i32, i32) {
    %c0_i32 = arith.constant 0 : i32
    %c0_i32_0 = arith.constant 0 : i32
    return %arg0, %c0_i32 : i32, i32
  }
  func.func @transform_1(%arg0: i32) -> (i32, i32) {
    %c0_i32 = arith.constant 0 : i32
    %c0_i32_0 = arith.constant 0 : i32
    %c0_i32_1 = arith.constant 0 : i32
    return %c0_i32, %c0_i32_0 : i32, i32
  }
  func.func @transform_2(%arg0: i32) -> (i32, i32) {
    %c0_i32 = arith.constant 0 : i32
    %c0_i32_0 = arith.constant 0 : i32
    %c0_i32_1 = arith.constant 0 : i32
    return %c0_i32, %c0_i32_0 : i32, i32
  }
  func.func @transform_3(%arg0: i32) -> (i32, i32) {
    %c0_i32 = arith.constant 0 : i32
    %c0_i32_0 = arith.constant 0 : i32
    %c0_i32_1 = arith.constant 0 : i32
    return %c0_i32, %c0_i32_0 : i32, i32
  }
  func.func @transform_4(%arg0: i32) -> (i32, i32) {
    %c0_i32 = arith.constant 0 : i32
    %c0_i32_0 = arith.constant 0 : i32
    %c0_i32_1 = arith.constant 0 : i32
    return %c0_i32, %c0_i32_0 : i32, i32
  }
  func.func @transform_5(%arg0: i32) -> (i32, i32) {
    %c0_i32 = arith.constant 0 : i32
    %c0_i32_0 = arith.constant 0 : i32
    return %arg0, %c0_i32 : i32, i32
  }
}

</mosaic_0001>

<bundles_post_ra>
// kernel: tpu_custom_call.1
= control target key start
LH: loop header
LB: loop body
LE: loop exit
PB: predicated region body
PF: predicated region fallthrough
CT: control target
= control target key end

     0   :  { %v694_v1 = vmov 0.0   ;;  %vm695_vm0 = vmmov 0   ;;  %s891_s0 = inlined_call_operand.vmem [shape: f32[4,128], index: 0, kind: input, shape index: {}]   ;;  %s892_s1 = inlined_call_operand.vmem [shape: f32[1,128], index: 1, kind: input, shape index: {}]   ;;  %s893_s2 = inlined_call_operand.vmem [shape: f32[1,128], index: 2, kind: input, shape index: {}]   ;;  %s894_s3 = inlined_call_operand.vmem [shape: bf16[128,4], index: 3, kind: input, shape index: {}]   ;;  %s895_s4 = inlined_call_operand.vmem [shape: bf16[4,128], index: 4, kind: input, shape index: {}]   ;;  %s896_s5 = inlined_call_operand.hbm [shape: f32[4,128], index: 5, kind: output, shape index: {}]  }
   0x1   :  { %v730_v0 = vld [vmem:[%s894_s3] sm:$0xff]   ;;  %537 = vmatprep.subr.bf16.mxu0 %v694_v1  ;;  %577 = vmatprep.subr.bf16.mxu1 %v694_v1  ;;  %v738_v2 = vld [vmem:[%s894_s3 + $0x8] sm:$0xff]   ;;  %v749_v3 = vld [vmem:[%s894_s3 + $0x10] sm:$0xff]  }
   0x2   :  { %538 = vmatpush3.bf16.msra.mxu0 %v730_v0  ;;  %553 = vmatprep.mubr.msk.bf16.mxu0 %vm695_vm0, %v694_v1 }
   0x3   :  { %539 = vmatprep.subr.bf16.mxu0 %v694_v1  ;;  %579 = vmatprep.mubr.msk.bf16.mxu1 %vm695_vm0, %v694_v1 }
   0x6   :  { %540 = vmatpush3.bf16.msra.mxu0 %v738_v2 }
   0x7   :  { %541 = vmatprep.subr.bf16.mxu0 %v694_v1 }
   0x8   :  { %10 = vsyncpa [#allocation3], 0  ;;  %v756_v4 = vld [vmem:[%s894_s3 + $0x18] sm:$0xff]   ;;  %v763_v5 = vld [vmem:[%s894_s3 + $0x20] sm:$0xff]   ;;  %vm181_vm1 = vcmask 1041408   ;;  %vm177_vm2 = vcmask 31744  }
   0x9   :  { %v768_v6 = vld [vmem:[%s891_s0] sm:$0xf]  ;;  %v777_v8 = vld [vmem:[%s894_s3 + $0x28] sm:$0xff]   ;;  %v784_v10 = vld [vmem:[%s894_s3 + $0x30] sm:$0xff]   ;;  %s696_s14 = smov [#allocation2]  }
   0xa   :  { %542 = vmatpush3.bf16.msra.mxu0 %v749_v3  ;;  %v40_v7 = vpack.c.bf16 %v768_v6, %v768_v6  ;;  %v792_v12 = vld [vmem:[%s894_s3 + $0x38] sm:$0xff]   ;;  %v38_v14 = vld [vmem:[%s895_s4] sm:$0x3]  ;;  %s471_s15 = sshll.u32 %s696_s14, 4  ;;  %s472_s15 = int_to_ptr.vmem [resolvable:$true] %s471_s15 }
   0xb   :  { %543 = vmatprep.subr.bf16.mxu0 %v694_v1  ;;  %v820_v15 = vsel %vm181_vm1, %v38_v14, 0  ;;  %v491_v47 = vld [vmem:[%s892_s1] ss:$0 sm:$0xff]  ;;  %s670_s16 = scalar_lea.vmem %s472_s15, 64  ;;  %p675_p1 = scmp.lt.s32.totalorder %s472_s15, %s472_s15 }
   0xc   :  { %v41_v9 = vunpack.c.l.bf16 %v40_v7  ;;  %578 = vmatpush3.bf16.msra.mxu1 %v820_v15  ;;  %v492_v51 = vld [vmem:[%s893_s2] ss:$0 sm:$0xff]  ;;  %p671_p0 = scmp.ne.s32.totalorder %s472_s15, %s670_s16  ;;  %p676_p2 = scmp.lt.s32.totalorder %s670_s16, %s670_s16 }
   0xd   :  { %583 = vmatprep.subr.bf16.mxu1 %v694_v1 }
   0xe   :  { %544 = vmatpush3.bf16.msra.mxu0 %v756_v4  ;;  %v42_v11 = vsub.f32 %v768_v6, %v41_v9  ;;  %p677_p3 = por %p676_p2, %p675_p1 }
   0xf   :  { %545 = vmatprep.subr.bf16.mxu0 %v694_v1 }
  0x10   :  { %v43_v13 = vpack.c.bf16 %v42_v11, %v42_v11  ;;  %p678_p4 = pnand %p677_p3, %p671_p0 }
  0x12   :  { %546 = vmatpush3.bf16.msra.mxu0 %v763_v5 }
  0x13   :  { %547 = vmatprep.subr.bf16.mxu0 %v694_v1 }
  0x16   :  { %548 = vmatpush3.bf16.msra.mxu0 %v777_v8 }
  0x17   :  { %549 = vmatprep.subr.bf16.mxu0 %v694_v1 }
  0x1a   :  { %550 = vmatpush3.bf16.msra.mxu0 %v784_v10 }
  0x1b   :  { %551 = vmatprep.subr.bf16.mxu0 %v694_v1 }
  0x1e   :  { %552 = vmatpush3.bf16.msra.mxu0 %v792_v12 }
  0x1f   :  { %557 = vmatprep.subr.bf16.mxu0 %v694_v1 }
  0x21   :  { %554 = vmatmul.mubr.bf16.vlgmr.msra.gmra.mrb[0].mxu0 %v43_v13 }
  0x22   :  { %558 = vmatpush3.bf16.msra.mxu0 %v730_v0  ;;  %573 = vmatprep.mubr.msk.bf16.mxu0 %vm695_vm0, %v694_v1 }
  0x23   :  { %559 = vmatprep.subr.bf16.mxu0 %v694_v1 }
  0x26   :  { %560 = vmatpush3.bf16.msra.mxu0 %v738_v2 }
  0x27   :  { %561 = vmatprep.subr.bf16.mxu0 %v694_v1 }
  0x2a   :  { %562 = vmatpush3.bf16.msra.mxu0 %v749_v3 }
  0x2b   :  { %563 = vmatprep.subr.bf16.mxu0 %v694_v1 }
  0x2e   :  { %564 = vmatpush3.bf16.msra.mxu0 %v756_v4 }
  0x2f   :  { %565 = vmatprep.subr.bf16.mxu0 %v694_v1 }
  0x32   :  { %566 = vmatpush3.bf16.msra.mxu0 %v763_v5 }
  0x33   :  { %567 = vmatprep.subr.bf16.mxu0 %v694_v1 }
  0x36   :  { %568 = vmatpush3.bf16.msra.mxu0 %v777_v8 }
  0x37   :  { %569 = vmatprep.subr.bf16.mxu0 %v694_v1 }
  0x3a   :  { %570 = vmatpush3.bf16.msra.mxu0 %v784_v10 }
  0x3b   :  { %571 = vmatprep.subr.bf16.mxu0 %v694_v1 }
  0x3e   :  { %572 = vmatpush3.bf16.msra.mxu0 %v792_v12 }
  0x3f   :  { %629 = vmatprep.subr.bf16.mxu0 %v694_v1 }
  0x41   :  { %574 = vmatmul.mubr.bf16.vlgmr.msra.gmra.mrb[0].mxu0 %v40_v7 }
  0x42   :  { %631 = vmatprep.mubr.msk.bf16.mxu0 %vm695_vm0, %v694_v1  ;;  %630 = vmatpush3.bf16.msra.mxu0 %v820_v15 }
  0x43   :  { %635 = vmatprep.subr.bf16.mxu0 %v694_v1 }
 0x114   :  { %v166_v16 = vpop.f32.mrb[0].mxu0 }
 0x115   :  { %v172_v17 = vmul.f32 0.03125, %v166_v16  ;;  %v575_v18 = vpop.f32.mrb[1].mxu0 }
 0x116   :  { %v169_v19 = vpop.f32.mrb[2].mxu0 }
 0x117   :  { %v173_v20 = vpack.c.bf16 %v172_v17, %v172_v17  ;;  %v576_v21 = vpop.f32.mrb[3].mxu0 }
 0x119   :  { %v174_v22 = vunpack.c.l.bf16 %v173_v20 }
 0x11b   :  { %v175_v23 = vsub.f32 %v172_v17, %v174_v22 }
 0x11d   :  { %v176_v24 = vpack.c.bf16 %v175_v23, %v175_v23 }
 0x11f   :  { %580 = vmatmul.mubr.msk.bf16.vlgmr.msra.gmra.mrb[0].mxu1 %vm177_vm2, %v176_v24 }
 0x120   :  { %584 = vmatpush3.bf16.msra.mxu1 %v820_v15  ;;  %585 = vmatprep.mubr.msk.bf16.mxu1 %vm695_vm0, %v694_v1 }
 0x121   :  { %589 = vmatprep.subr.bf16.mxu1 %v694_v1 }
 0x12b   :  { %586 = vmatmul.mubr.msk.bf16.vlgmr.msra.gmra.mrb[0].mxu1 %vm177_vm2, %v173_v20 }
 0x12c   :  { %590 = vmatpush3.bf16.msra.mxu1 %v730_v0  ;;  %605 = vmatprep.mubr.msk.bf16.mxu1 %vm695_vm0, %v694_v1 }
 0x12d   :  { %591 = vmatprep.subr.bf16.mxu1 %v694_v1 }
 0x130   :  { %592 = vmatpush3.bf16.msra.mxu1 %v738_v2 }
 0x131   :  { %593 = vmatprep.subr.bf16.mxu1 %v694_v1 }
 0x134   :  { %594 = vmatpush3.bf16.msra.mxu1 %v749_v3 }
 0x135   :  { %595 = vmatprep.subr.bf16.mxu1 %v694_v1 }
 0x138   :  { %596 = vmatpush3.bf16.msra.mxu1 %v756_v4 }
 0x139   :  { %597 = vmatprep.subr.bf16.mxu1 %v694_v1 }
 0x13c   :  { %598 = vmatpush3.bf16.msra.mxu1 %v763_v5 }
 0x13d   :  { %599 = vmatprep.subr.bf16.mxu1 %v694_v1 }
 0x140   :  { %600 = vmatpush3.bf16.msra.mxu1 %v777_v8 }
 0x141   :  { %601 = vmatprep.subr.bf16.mxu1 %v694_v1 }
 0x144   :  { %602 = vmatpush3.bf16.msra.mxu1 %v784_v10 }
 0x145   :  { %603 = vmatprep.subr.bf16.mxu1 %v694_v1 }
 0x148   :  { %604 = vmatpush3.bf16.msra.mxu1 %v792_v12 }
 0x149   :  { %609 = vmatprep.subr.bf16.mxu1 %v694_v1 }
 0x1fe   :  { %v262_v25 = vpop.f32.mrb[0].mxu1 }
 0x1ff   :  { %v268_v26 = vsub.f32 %v768_v6, %v262_v25  ;;  %v587_v27 = vpop.f32.mrb[1].mxu1 }
 0x200   :  { %v265_v28 = vpop.f32.mrb[2].mxu1 }
 0x201   :  { %v269_v29 = vmul.f32 %v268_v26, %v268_v26  ;;  %v588_v30 = vpop.f32.mrb[3].mxu1 }
 0x203   :  { %v270_v31 = vpack.c.bf16 %v269_v29, %v269_v29 }
 0x205   :  { %v271_v32 = vunpack.c.l.bf16 %v270_v31 }
 0x207   :  { %v272_v33 = vsub.f32 %v269_v29, %v271_v32 }
 0x209   :  { %v273_v34 = vpack.c.bf16 %v272_v33, %v272_v33 }
 0x20b   :  { %606 = vmatmul.mubr.bf16.vlgmr.msra.gmra.mrb[4].mxu1 %v273_v34 }
 0x20c   :  { %610 = vmatpush3.bf16.msra.mxu1 %v730_v0  ;;  %625 = vmatprep.mubr.msk.bf16.mxu1 %vm695_vm0, %v694_v1 }
 0x20d   :  { %611 = vmatprep.subr.bf16.mxu1 %v694_v1 }
 0x210   :  { %612 = vmatpush3.bf16.msra.mxu1 %v738_v2 }
 0x211   :  { %613 = vmatprep.subr.bf16.mxu1 %v694_v1 }
 0x214   :  { %614 = vmatpush3.bf16.msra.mxu1 %v749_v3 }
 0x215   :  { %615 = vmatprep.subr.bf16.mxu1 %v694_v1 }
 0x218   :  { %616 = vmatpush3.bf16.msra.mxu1 %v756_v4 }
 0x219   :  { %617 = vmatprep.subr.bf16.mxu1 %v694_v1 }
 0x21c   :  { %618 = vmatpush3.bf16.msra.mxu1 %v763_v5 }
 0x21d   :  { %619 = vmatprep.subr.bf16.mxu1 %v694_v1 }
 0x220   :  { %620 = vmatpush3.bf16.msra.mxu1 %v777_v8 }
 0x221   :  { %621 = vmatprep.subr.bf16.mxu1 %v694_v1 }
 0x224   :  { %622 = vmatpush3.bf16.msra.mxu1 %v784_v10 }
 0x225   :  { %623 = vmatprep.subr.bf16.mxu1 %v694_v1 }
 0x228   :  { %624 = vmatpush3.bf16.msra.mxu1 %v792_v12 }
 0x22b   :  { %626 = vmatmul.mubr.bf16.vlgmr.msra.gmra.mrb[4].mxu1 %v270_v31 }
 0x2fe   :  { %v348_v35 = vpop.f32.mrb[4].mxu1 }
 0x2ff   :  { %v354_v36 = vmul.f32 0.03125, %v348_v35  ;;  %v627_v37 = vpop.f32.mrb[5].mxu1 }
 0x300   :  { %v351_v38 = vpop.f32.mrb[6].mxu1 }
 0x301   :  { %v355_v39 = vadd.f32 1e-12, %v354_v36  ;;  %v628_v40 = vpop.f32.mrb[7].mxu1 }
 0x303   :  { %668 = vrsqrt.f32 %v355_v39 }
 0x30d   :  { %v669_v41 = vpop.eup %668 }
 0x30e   :  { %v357_v42 = vpack.c.bf16 %v669_v41, %v669_v41 }
 0x310   :  { %v358_v43 = vunpack.c.l.bf16 %v357_v42 }
 0x312   :  { %v359_v44 = vsub.f32 %v669_v41, %v358_v43 }
 0x314   :  { %v360_v45 = vpack.c.bf16 %v359_v44, %v359_v44 }
 0x316   :  { %632 = vmatmul.mubr.msk.bf16.vlgmr.msra.gmra.mrb[4].mxu0 %vm177_vm2, %v360_v45 }
 0x317   :  { %636 = vmatpush3.bf16.msra.mxu0 %v820_v15  ;;  %637 = vmatprep.mubr.msk.bf16.mxu0 %vm695_vm0, %v694_v1 }
 0x322   :  { %638 = vmatmul.mubr.msk.bf16.vlgmr.msra.gmra.mrb[4].mxu0 %vm177_vm2, %v357_v42 }
 0x3f5   :  { %v441_v46 = vpop.f32.mrb[4].mxu0 }
 0x3f6   :  { %v447_v48 = vmul.f32 %v441_v46, %v268_v26  ;;  %v639_v49 = vpop.f32.mrb[5].mxu0 }
 0x3f7   :  { %v444_v50 = vpop.f32.mrb[6].mxu0 }
 0x3f8   :  { %v456_v52 = vmul.f32 %v491_v47, %v447_v48  ;;  %v640_v53 = vpop.f32.mrb[7].mxu0 }
 0x3fa   :  { %v463_v54 = vadd.f32 %v492_v51, %v456_v52 }
 0x3fc   :  { %464 = vst [vmem:[#allocation2] sm:$0xf] %v463_v54 }
 0x3fd   :  { %681 = shalt.err (!%p678_p4)
}
 0x3fe   :  { %s682_s18 = scalar_lea.hbm %s896_s5, 64 }
 0x3ff   :  { %p683_p5 = scmp.ne.s32.totalorder %s896_s5, %s682_s18  ;;  %p686_p6 = scmp.lt.u32.totalorder %s682_s18, %s896_s5 }
 0x401   :  { %p688_p7 = pnand %p686_p6, %p683_p5 }
 0x403   :  { %691 = shalt.err (!%p688_p7)
}
 0x404   :  { %474 = dma.vmem_to_hbm [thread:$0]  %s472_s15, 64, %s896_s5, [#allocation3]  }
 0x405   :  { %692 = dma.done.wait [#allocation3], 64  }
 0x406   :  { %693 = vsyncadd [#allocation3], 4294967232 }
 0x407   :  { %478 = vsyncpa [#allocation3], 1 }

</bundles_post_ra>
